<compile_context>
chip_gen: v6e
topology: v6e:2x2x1
jax: 0.10.0
libtpu: 0.0.40
codegen_flags: <defaults>
</compile_context>

<pallas_src>
import functools

import jax
import jax.numpy as jnp
from jax import lax
from jax.experimental import pallas as pl
from jax.experimental.pallas import tpu as pltpu

NUM_GROUPS = 32
EPS = 1e-6


# --------------------------------------------------------------------------------------
# Per-generation knobs
# --------------------------------------------------------------------------------------
def _vmem_limit_bytes():
    """~3/4 of physical VMEM: ~96 MiB on v5e/v6e (128 MiB), ~48 MiB on v7x (64 MiB)."""
    try:
        info = pltpu.get_tpu_info()
        cap = getattr(info, "vmem_capacity_bytes", None)
        if cap:
            return int(cap) * 3 // 4
    except Exception:
        pass
    return 48 * 1024 * 1024  # conservative fallback (safe on every generation)


def _device_kind():
    try:
        return jax.devices()[0].device_kind.lower()
    except Exception:
        return ""


def _pick_tile(n, candidates):
    for t in candidates:
        if t <= n and n % t == 0:
            return t
    return n  # small / non-128-divisible N: use a single full tile
    # TODO(synk): for large H*W not divisible by 128, pad N to a multiple of 128 and
    # mask the padded keys instead of falling back to a full-N tile.


# --------------------------------------------------------------------------------------
# Stage 1: GroupNorm statistics (channel-major, N-tiled, no transpose / no gmat matmul)
# --------------------------------------------------------------------------------------
def _gn_stats_kernel(x_ref, s_ref, ss_ref, s_sc, ss_sc):
    ni = pl.program_id(1)

    @pl.when(ni == 0)
    def _():
        s_sc[...] = jnp.zeros_like(s_sc)
        ss_sc[...] = jnp.zeros_like(ss_sc)

    x = x_ref[0]                                          # (C, tn) f32
    s_sc[...] += jnp.sum(x, axis=-1, keepdims=True)       # (C, 1)
    ss_sc[...] += jnp.sum(x * x, axis=-1, keepdims=True)  # (C, 1)

    @pl.when(ni == pl.num_programs(1) - 1)
    def _():
        s_ref[0] = s_sc[...]
        ss_ref[0] = ss_sc[...]


# --------------------------------------------------------------------------------------
# Stage 2: normalize + fused K/V projection, done exactly once per element.
# K is written position-major (N, C) so stage 3 never transposes; V stays (C, N).
# --------------------------------------------------------------------------------------
def _kv_project_kernel(x_ref, mean_ref, inv_ref, wkv_ref, bkv_ref, k_ref, v_ref):
    c = mean_ref.shape[1]
    cdt = wkv_ref.dtype
    h = ((x_ref[0] - mean_ref[0]) * inv_ref[0]).astype(cdt)                  # (C, tn)
    kv = jnp.dot(wkv_ref[...], h, preferred_element_type=jnp.float32) + bkv_ref[...]
    k_ref[0] = jnp.transpose(kv[:c]).astype(cdt)                             # (tn, C)
    v_ref[0] = kv[c:].astype(cdt)                                            # (C, tn)


# --------------------------------------------------------------------------------------
# Stage 3: flash attention, channel-major, transposed scores (no in-kernel transposes)
# --------------------------------------------------------------------------------------
def _flash_attn_kernel(xq_ref, mean_ref, inv_ref, k_ref, v_ref,
                       wq_ref, bq_ref, wp_ref, bp_ref, o_ref,
                       q_sc, m_sc, l_sc, acc_sc, *, tk, kv_resident):
    ki = pl.program_id(2)
    nk = pl.num_programs(2)
    cdt = wq_ref.dtype

    # ---- once per (batch, query tile): project Q channel-major, reset softmax state ----
    @pl.when(ki == 0)
    def _():
        hq = ((xq_ref[0] - mean_ref[0]) * inv_ref[0]).astype(cdt)            # (C, tq)
        q = jnp.dot(wq_ref[...], hq, preferred_element_type=jnp.float32) + bq_ref[...]
        q_sc[...] = q.astype(cdt)             # GN affine + C**-0.5 already folded in
        m_sc[...] = jnp.full(m_sc.shape, -jnp.inf, jnp.float32)
        l_sc[...] = jnp.zeros(l_sc.shape, jnp.float32)
        acc_sc[...] = jnp.zeros(acc_sc.shape, jnp.float32)

    # ---- current K/V tile (bf16, already normalized + projected in stage 2) ----
    off = pl.multiple_of(ki * tk, tk) if kv_resident else 0
    k = k_ref[0, pl.ds(off, tk), :]           # (tk, C) position-major
    v = v_ref[0, :, pl.ds(off, tk)]           # (C, tk) channel-major

    # ---- transposed scores: sT[nk, nq] = sum_c K[nk,c] * Q[c,nq] (native MXU shapes) ----
    sT = jnp.dot(k, q_sc[...], preferred_element_type=jnp.float32)           # (tk, tq)

    # ---- online softmax; per-query stats live on the lane axis ----
    m_new = jnp.maximum(m_sc[...], jnp.max(sT, axis=0, keepdims=True))       # (1, tq)
    alpha = jnp.exp(m_sc[...] - m_new)
    p = jnp.exp(sT - m_new)                                                  # (tk, tq)
    l_sc[...] = alpha * l_sc[...] + jnp.sum(p, axis=0, keepdims=True)
    acc_sc[...] = alpha * acc_sc[...] + jnp.dot(
        v, p.astype(cdt), preferred_element_type=jnp.float32)                # (C, tq)
    m_sc[...] = m_new

    # ---- finalize: normalize, proj_out, residual; lane-dense (C, tq) store ----
    @pl.when(ki == nk - 1)
    def _():
        attn = (acc_sc[...] * pl.reciprocal(l_sc[...], approx=False)).astype(cdt)
        out = jnp.dot(wp_ref[...], attn, preferred_element_type=jnp.float32) + bp_ref[...]
        o_ref[0] = xq_ref[0] + out


# --------------------------------------------------------------------------------------
# Wrapper
# --------------------------------------------------------------------------------------
def attn_block_pallas(x_nchw, params, tq=None, tk=None, matmul_dtype=jnp.bfloat16):
    """x_nchw: (B, C, H, W) float32 (PyTorch NCHW).  Returns the same shape."""
    B, C, H, W = x_nchw.shape
    N = H * W
    assert C % NUM_GROUPS == 0, "GroupNorm(32) needs C % 32 == 0"

    vmem_limit = _vmem_limit_bytes()
    kind = _device_kind()
    small_mxu = any(t in kind for t in ("v2", "v3", "v4", "v5"))  # 128-wide MXUs

    # Tile selection: 256-wide q tiles fill the 256x256 MXUs on v6e/v7x; 128 is native
    # on v5e-class chips (and easier on their VPU/store budget).
    if tq is None:
        tq = _pick_tile(N, (128,) if small_mxu else (256, 128))
    if tk is None:
        tk = _pick_tile(N, (256, 128) if small_mxu else (512, 256, 128))
    assert N % tq == 0 and N % tk == 0, "H*W must be divisible by the chosen tiles"
    # v7x has 2 TensorCores: make sure the parallel grid axes expose >= 2 points.
    if B * (N // tq) < 2 and tq % 2 == 0 and tq >= 16 and N % (tq // 2) == 0:
        tq //= 2

    # NCHW -> channel-first (B, C, N): a free reshape, no HBM transpose pass.
    x = x_nchw.reshape(B, C, N).astype(jnp.float32)

    # ---- Stage 1: per-channel sums (Pallas), tiny per-group combine in the wrapper ----
    tn = _pick_tile(N, (2048, 1024, 512, 256, 128))
    s, ss = pl.pallas_call(
        _gn_stats_kernel,
        out_shape=(jax.ShapeDtypeStruct((B, C, 1), jnp.float32),
                   jax.ShapeDtypeStruct((B, C, 1), jnp.float32)),
        grid=(B, N // tn),
        in_specs=[pl.BlockSpec((1, C, tn), lambda b, ni: (b, 0, ni))],
        out_specs=(pl.BlockSpec((1, C, 1), lambda b, ni: (b, 0, 0)),
                   pl.BlockSpec((1, C, 1), lambda b, ni: (b, 0, 0))),
        scratch_shapes=[pltpu.VMEM((C, 1), jnp.float32),
                        pltpu.VMEM((C, 1), jnp.float32)],
        compiler_params=pltpu.CompilerParams(
            dimension_semantics=("parallel", "arbitrary"),
            vmem_limit_bytes=vmem_limit),
    )(x)

    cpg = C // NUM_GROUPS
    cnt = float(N * cpg)
    gs = s.reshape(B, NUM_GROUPS, cpg).sum(axis=-1)
    gss = ss.reshape(B, NUM_GROUPS, cpg).sum(axis=-1)
    gmean = gs / cnt
    # TODO(synk): single-pass E[x^2]-E[x]^2 variance (clamped); switch to a centered
    # two-pass formulation if activation magnitudes make f32 cancellation a problem.
    gvar = jnp.maximum(gss / cnt - gmean * gmean, 0.0)
    ginv = lax.rsqrt(gvar + EPS)
    mean = jnp.repeat(gmean, cpg, axis=-1).reshape(B, C, 1)
    inv = jnp.repeat(ginv, cpg, axis=-1).reshape(B, C, 1)

    # ---- Fold GroupNorm affine + C**-0.5 scale into the (out, in) projection weights ----
    gamma = params["gamma"].astype(jnp.float32)
    beta = params["beta"].astype(jnp.float32)
    scale = float(C) ** -0.5
    wq_f = (params["wq"] * gamma[None, :]) * scale
    bq_f = (params["wq"] @ beta + params["bq"]) * scale
    wk_f = params["wk"] * gamma[None, :]
    bk_f = params["wk"] @ beta + params["bk"]
    wv_f = params["wv"] * gamma[None, :]
    bv_f = params["wv"] @ beta + params["bv"]
    wkv_f = jnp.concatenate([wk_f, wv_f], axis=0)                    # (2C, C)
    bkv_f = jnp.concatenate([bk_f, bv_f])[:, None]                   # (2C, 1)

    wq_m = wq_f.astype(matmul_dtype)
    wkv_m = wkv_f.astype(matmul_dtype)
    wp_m = params["wp"].astype(matmul_dtype)                         # (C, C)
    bq_b = bq_f[:, None].astype(jnp.float32)                         # (C, 1)
    bkv_b = bkv_f.astype(jnp.float32)                                # (2C, 1)
    bp_b = params["bp"][:, None].astype(jnp.float32)                 # (C, 1)

    # ---- Stage 2: project K/V once per element, bf16, K position-major ----
    tkv = _pick_tile(N, (1024, 512, 256, 128))
    k_nm, v_cm = pl.pallas_call(
        _kv_project_kernel,
        out_shape=(jax.ShapeDtypeStruct((B, N, C), matmul_dtype),
                   jax.ShapeDtypeStruct((B, C, N), matmul_dtype)),
        grid=(B, N // tkv),
        in_specs=[pl.BlockSpec((1, C, tkv), lambda b, ni: (b, 0, ni)),
                  pl.BlockSpec((1, C, 1), lambda b, ni: (b, 0, 0)),
                  pl.BlockSpec((1, C, 1), lambda b, ni: (b, 0, 0)),
                  pl.BlockSpec((2 * C, C), lambda b, ni: (0, 0)),
                  pl.BlockSpec((2 * C, 1), lambda b, ni: (0, 0))],
        out_specs=(pl.BlockSpec((1, tkv, C), lambda b, ni: (b, ni, 0)),
                   pl.BlockSpec((1, C, tkv), lambda b, ni: (b, 0, ni))),
        compiler_params=pltpu.CompilerParams(
            dimension_semantics=("parallel", "parallel"),
            vmem_limit_bytes=vmem_limit),
    )(x, mean, inv, wkv_m, bkv_b)

    # ---- Stage 3: flash attention ----
    nq, nk = N // tq, N // tk
    # Keep K+V VMEM-resident for the whole batch when the (double-buffered) bf16 blocks
    # fit the per-generation budget; otherwise stream (tk, C)/(C, tk) tiles from HBM.
    kv_resident = (4 * N * C * 2) <= vmem_limit // 2
    if kv_resident:
        k_spec = pl.BlockSpec((1, N, C), lambda b, qi, ki: (b, 0, 0))
        v_spec = pl.BlockSpec((1, C, N), lambda b, qi, ki: (b, 0, 0))
        tk_eff = tk
    else:
        k_spec = pl.BlockSpec((1, tk, C), lambda b, qi, ki: (b, ki, 0))
        v_spec = pl.BlockSpec((1, C, tk), lambda b, qi, ki: (b, 0, ki))
        tk_eff = tk
    # TODO(synk): when VMEM is tight (v7x) with resident K/V, pin the constant-index
    # K/V/weight BlockSpecs to a single buffer (pipeline_mode=pl.Buffered(1)).

    wmap = lambda b, qi, ki: (0, 0)
    kernel = functools.partial(_flash_attn_kernel, tk=tk_eff, kv_resident=kv_resident)

    out = pl.pallas_call(
        kernel,
        out_shape=jax.ShapeDtypeStruct((B, C, N), jnp.float32),
        grid=(B, nq, nk),
        in_specs=[
            pl.BlockSpec((1, C, tq), lambda b, qi, ki: (b, 0, qi)),   # x: queries + residual
            pl.BlockSpec((1, C, 1), lambda b, qi, ki: (b, 0, 0)),     # mean
            pl.BlockSpec((1, C, 1), lambda b, qi, ki: (b, 0, 0)),     # inv_std
            k_spec,                                                   # K (position-major bf16)
            v_spec,                                                   # V (channel-major bf16)
            pl.BlockSpec((C, C), wmap),                               # Wq (affine+scale folded)
            pl.BlockSpec((C, 1), wmap),                               # bq (folded)
            pl.BlockSpec((C, C), wmap),                               # Wp
            pl.BlockSpec((C, 1), wmap),                               # bp
        ],
        out_specs=pl.BlockSpec((1, C, tq), lambda b, qi, ki: (b, 0, qi)),
        scratch_shapes=[
            pltpu.VMEM((C, tq), matmul_dtype),   # projected Q tile
            pltpu.VMEM((1, tq), jnp.float32),    # running max (per query, lane axis)
            pltpu.VMEM((1, tq), jnp.float32),    # running sum
            pltpu.VMEM((C, tq), jnp.float32),    # output accumulator (channel-major)
        ],
        compiler_params=pltpu.CompilerParams(
            dimension_semantics=("parallel", "parallel", "arbitrary"),
            vmem_limit_bytes=vmem_limit),
    )(x, mean, inv, k_nm, v_cm, wq_m, bq_b, wp_m, bp_b)

    return out.reshape(B, C, H, W)


# --------------------------------------------------------------------------------------
# Pure-JAX reference mirroring the PyTorch forward exactly (NCHW, f32)
# --------------------------------------------------------------------------------------
def ref_attn_block(x, params):
    B, C, H, W = x.shape
    N = H * W
    cpg = C // NUM_GROUPS
    xg = x.reshape(B, NUM_GROUPS, cpg, H, W)
    mean = xg.mean(axis=(2, 3, 4), keepdims=True)
    var = xg.var(axis=(2, 3, 4), keepdims=True)
    hn = (xg - mean) / jnp.sqrt(var + EPS)
    hn = hn.reshape(B, C, H, W) * params["gamma"].reshape(1, C, 1, 1) \
         + params["beta"].reshape(1, C, 1, 1)
    hf = hn.reshape(B, C, N)
    q = jnp.einsum("oi,bin->bon", params["wq"], hf) + params["bq"][None, :, None]
    k = jnp.einsum("oi,bin->bon", params["wk"], hf) + params["bk"][None, :, None]
    v = jnp.einsum("oi,bin->bon", params["wv"], hf) + params["bv"][None, :, None]
    w_ = jnp.einsum("bcn,bcm->bnm", q, k) * (float(C) ** -0.5)
    w_ = jax.nn.softmax(w_, axis=2)
    h_ = jnp.einsum("bcm,bnm->bcn", v, w_)
    h_ = jnp.einsum("oi,bin->bon", params["wp"], h_) + params["bp"][None, :, None]
    return x + h_.reshape(B, C, H, W)


def init_params(key, C):
    ks = jax.random.split(key, 10)
    scale = 1.0 / jnp.sqrt(C)
    return {
        "gamma": jax.random.normal(ks[0], (C,), jnp.float32) * 0.1 + 1.0,
        "beta": jax.random.normal(ks[1], (C,), jnp.float32) * 0.1,
        "wq": jax.random.normal(ks[2], (C, C), jnp.float32) * scale,
        "bq": jax.random.normal(ks[3], (C,), jnp.float32) * 0.1,
        "wk": jax.random.normal(ks[4], (C, C), jnp.float32) * scale,
        "bk": jax.random.normal(ks[5], (C,), jnp.float32) * 0.1,
        "wv": jax.random.normal(ks[6], (C, C), jnp.float32) * scale,
        "bv": jax.random.normal(ks[7], (C,), jnp.float32) * 0.1,
        "wp": jax.random.normal(ks[8], (C, C), jnp.float32) * scale,
        "bp": jax.random.normal(ks[9], (C,), jnp.float32) * 0.1,
    }


if __name__ == "__main__":
    # C must be divisible by 32 (GroupNorm groups); N = H*W = 256 with tq=tk=128 gives a
    # (B, 2, 2) grid, exercising both the multi-q-tile and multi-kv-tile paths.
    B, C, H, W = 2, 64, 16, 16
    key = jax.random.PRNGKey(0)
    kx, kp = jax.random.split(key)
    x = jax.random.normal(kx, (B, C, H, W), jnp.float32)
    params = init_params(kp, C)

    out = attn_block_pallas(x, params, tq=128, tk=128)
    out = jax.block_until_ready(out)

    ref = jax.block_until_ready(ref_attn_block(x, params))
    assert out.shape == (B, C, H, W)
    err = float(jnp.max(jnp.abs(out - ref)))
    # bf16 MXU operands (f32 accumulation) dominate the mismatch vs the f32 reference.
    assert err < 1e-1, f"max abs err {err}"

    print("KERNEL_OK")
</pallas_src>

<mosaic_0001>
module attributes {stable_mosaic.version = 11 : i64} {
  func.func @_gn_stats_kernel(%arg0: i32, %arg1: i32, %arg2: memref<1x64x256xf32, #tpu.memory_space<vmem>>, %arg3: memref<1x64x1xf32, #tpu.memory_space<vmem>>, %arg4: memref<1x64x1xf32, #tpu.memory_space<vmem>>, %arg5: memref<64x1xf32, #tpu.memory_space<vmem>>, %arg6: memref<64x1xf32, #tpu.memory_space<vmem>>) attributes {dimension_semantics = [#tpu.dimension_semantics<parallel>, #tpu.dimension_semantics<arbitrary>], iteration_bounds = array<i64: 2, 1>, scalar_prefetch = 0 : i64, scratch_operands = 2 : i64, tpu.core_type = #tpu.core_type<tc>, window_params = [{transform_indices = @transform_0, window_bounds = array<i64: 1, 64, 256>}, {transform_indices = @transform_1, window_bounds = array<i64: 1, 64, 1>}, {transform_indices = @transform_2, window_bounds = array<i64: 1, 64, 1>}]} {
    %c0_i32 = arith.constant 0 : i32
    %0 = arith.cmpi eq, %arg1, %c0_i32 : i32
    %1 = arith.extui %0 : i1 to i32
    %c0_i32_0 = arith.constant 0 : i32
    %2 = arith.cmpi ne, %1, %c0_i32_0 : i32
    scf.if %2 {
      %cst_14 = arith.constant 0.000000e+00 : f32
      %19 = vector.broadcast %cst_14 : f32 to vector<64x1xf32>
      %c0_15 = arith.constant 0 : index
      %c0_16 = arith.constant 0 : index
      %20 = vector.load %arg5[%c0_15, %c0_16] : memref<64x1xf32, #tpu.memory_space<vmem>>, vector<64x1xf32>
      tpu.vector_store %arg5[%c0_15, %c0_16], %19 {strides = array<i32>} : memref<64x1xf32, #tpu.memory_space<vmem>>, vector<64x1xf32>,
      %cst_17 = arith.constant 0.000000e+00 : f32
      %21 = vector.broadcast %cst_17 : f32 to vector<64x1xf32>
      %c0_18 = arith.constant 0 : index
      %c0_19 = arith.constant 0 : index
      %22 = vector.load %arg6[%c0_18, %c0_19] : memref<64x1xf32, #tpu.memory_space<vmem>>, vector<64x1xf32>
      tpu.vector_store %arg6[%c0_18, %c0_19], %21 {strides = array<i32>} : memref<64x1xf32, #tpu.memory_space<vmem>>, vector<64x1xf32>,
    } else {
    }
    %c0 = arith.constant 0 : index
    %c0_1 = arith.constant 0 : index
    %c0_2 = arith.constant 0 : index
    %3 = vector.load %arg2[%c0, %c0_1, %c0_2] : memref<1x64x256xf32, #tpu.memory_space<vmem>>, vector<1x64x256xf32>
    %4 = vector.shape_cast %3 : vector<1x64x256xf32> to vector<64x256xf32>
    %c0_3 = arith.constant 0 : index
    %c0_4 = arith.constant 0 : index
    %5 = vector.load %arg5[%c0_3, %c0_4] : memref<64x1xf32, #tpu.memory_space<vmem>>, vector<64x1xf32>
    %cst = arith.constant dense<0.000000e+00> : vector<64xf32>
    %6 = vector.multi_reduction <add>, %4, %cst [1] : vector<64x256xf32> to vector<64xf32>
    %7 = vector.shape_cast %6 : vector<64xf32> to vector<64x1xf32>
    %8 = arith.addf %5, %7 : vector<64x1xf32>
    %c0_5 = arith.constant 0 : index
    %c0_6 = arith.constant 0 : index
    %9 = vector.load %arg5[%c0_5, %c0_6] : memref<64x1xf32, #tpu.memory_space<vmem>>, vector<64x1xf32>
    tpu.vector_store %arg5[%c0_5, %c0_6], %8 {strides = array<i32>} : memref<64x1xf32, #tpu.memory_space<vmem>>, vector<64x1xf32>,
    %c0_7 = arith.constant 0 : index
    %c0_8 = arith.constant 0 : index
    %10 = vector.load %arg6[%c0_7, %c0_8] : memref<64x1xf32, #tpu.memory_space<vmem>>, vector<64x1xf32>
    %11 = arith.mulf %4, %4 : vector<64x256xf32>
    %cst_9 = arith.constant dense<0.000000e+00> : vector<64xf32>
    %12 = vector.multi_reduction <add>, %11, %cst_9 [1] : vector<64x256xf32> to vector<64xf32>
    %13 = vector.shape_cast %12 : vector<64xf32> to vector<64x1xf32>
    %14 = arith.addf %10, %13 : vector<64x1xf32>
    %c0_10 = arith.constant 0 : index
    %c0_11 = arith.constant 0 : index
    %15 = vector.load %arg6[%c0_10, %c0_11] : memref<64x1xf32, #tpu.memory_space<vmem>>, vector<64x1xf32>
    tpu.vector_store %arg6[%c0_10, %c0_11], %14 {strides = array<i32>} : memref<64x1xf32, #tpu.memory_space<vmem>>, vector<64x1xf32>,
    %c0_i32_12 = arith.constant 0 : i32
    %16 = arith.cmpi eq, %arg1, %c0_i32_12 : i32
    %17 = arith.extui %16 : i1 to i32
    %c0_i32_13 = arith.constant 0 : i32
    %18 = arith.cmpi ne, %17, %c0_i32_13 : i32
    scf.if %18 {
      %c0_14 = arith.constant 0 : index
      %c0_15 = arith.constant 0 : index
      %19 = vector.load %arg5[%c0_14, %c0_15] : memref<64x1xf32, #tpu.memory_space<vmem>>, vector<64x1xf32>
      %c0_16 = arith.constant 0 : index
      %c0_17 = arith.constant 0 : index
      %c0_18 = arith.constant 0 : index
      %20 = vector.load %arg3[%c0_16, %c0_17, %c0_18] : memref<1x64x1xf32, #tpu.memory_space<vmem>>, vector<1x64x1xf32>
      %21 = vector.shape_cast %20 : vector<1x64x1xf32> to vector<64x1xf32>
      %22 = vector.shape_cast %19 : vector<64x1xf32> to vector<1x64x1xf32>
      tpu.vector_store %arg3[%c0_16, %c0_17, %c0_18], %22 {strides = array<i32>} : memref<1x64x1xf32, #tpu.memory_space<vmem>>, vector<1x64x1xf32>,
      %c0_19 = arith.constant 0 : index
      %c0_20 = arith.constant 0 : index
      %23 = vector.load %arg6[%c0_19, %c0_20] : memref<64x1xf32, #tpu.memory_space<vmem>>, vector<64x1xf32>
      %c0_21 = arith.constant 0 : index
      %c0_22 = arith.constant 0 : index
      %c0_23 = arith.constant 0 : index
      %24 = vector.load %arg4[%c0_21, %c0_22, %c0_23] : memref<1x64x1xf32, #tpu.memory_space<vmem>>, vector<1x64x1xf32>
      %25 = vector.shape_cast %24 : vector<1x64x1xf32> to vector<64x1xf32>
      %26 = vector.shape_cast %23 : vector<64x1xf32> to vector<1x64x1xf32>
      tpu.vector_store %arg4[%c0_21, %c0_22, %c0_23], %26 {strides = array<i32>} : memref<1x64x1xf32, #tpu.memory_space<vmem>>, vector<1x64x1xf32>,
    } else {
    }
    return
  }
  func.func @transform_0(%arg0: i32, %arg1: i32) -> (i32, i32, i32) {
    %c0_i32 = arith.constant 0 : i32
    %c0_i32_0 = arith.constant 0 : i32
    return %arg0, %c0_i32, %arg1 : i32, i32, i32
  }
  func.func @transform_1(%arg0: i32, %arg1: i32) -> (i32, i32, i32) {
    %c0_i32 = arith.constant 0 : i32
    %c0_i32_0 = arith.constant 0 : i32
    %c0_i32_1 = arith.constant 0 : i32
    return %arg0, %c0_i32, %c0_i32_0 : i32, i32, i32
  }
  func.func @transform_2(%arg0: i32, %arg1: i32) -> (i32, i32, i32) {
    %c0_i32 = arith.constant 0 : i32
    %c0_i32_0 = arith.constant 0 : i32
    %c0_i32_1 = arith.constant 0 : i32
    return %arg0, %c0_i32, %c0_i32_0 : i32, i32, i32
  }
}

</mosaic_0001>

<bundles_post_ra>
// kernel: tpu_custom_call.1
= control target key start
LH: loop header
LB: loop body
LE: loop exit
PB: predicated region body
PF: predicated region fallthrough
CT: control target
= control target key end

     0   :  { %8 = vsyncpa [#allocation5], 0  ;;  %s857_s0 = inlined_call_operand.hbm [shape: f32[2,64,256], index: 0, kind: input, shape index: {}]   ;;  %s858_s1 = inlined_call_operand.vmem [shape: f32[2,64,1], index: 1, kind: output, shape index: {0}]   ;;  %s859_s2 = inlined_call_operand.vmem [shape: f32[2,64,1], index: 2, kind: output, shape index: {1}]  }
   0x1   :  { %10 = vsyncpa [#allocation5 + $0x1], 0  ;;  %s665_s9 = smov 0   ;;  %s667_s10 = smov 0  }
   0x2   :  { %s669_s11 = smov 0   ;;  %s671_s12 = smov 0  }
   0x3   :  { %s673_s13 = smov 0   ;;  %s675_s14 = smov 0  }
   0x4 LB: > { %s490_s15 = sadd.s32 4294967295, %s644_s14   ;;  %s28_s16 = sadd.s32 1, %s640_s13  ;;  %s644_s14 = sphi %s675_s14, %s16_s14   ;;  %s640_s13 = sphi %s673_s13, %s867_s13   ;;  %s636_s12 = sphi %s671_s12, %s866_s12   ;;  %s632_s11 = sphi %s669_s11, %s865_s11   ;;  %s628_s10 = sphi %s667_s10, %s864_s10   ;;  %s624_s9 = sphi %s665_s9, %s863_s9  }
   0x5   : > { %p30_p0 = scmp.ge.s32.totalorder %s28_s16, 2  ;;  %s37_s17 = sadd.s32 1, %s632_s11 }
   0x6   : > { %p44_p1 = scmp.ne.s32.totalorder %s632_s11, %s628_s10  ;;  %p45_p2 = scmp.eq.s32.totalorder %s644_s14, 0 }
   0x7   : > { %s869_s16 = smov (%p30_p0, %s28_s16), 0  ;;  %p50_p4 = scmp.ne.s32.totalorder %s628_s10, %s624_s9 }
   0x8   : > { %p701_p3 = por %p45_p2, %p44_p1  ;;  %s32_s19 = ssub.s32 %s640_s13, %s869_s16 }
   0x9   : > { %p51_p5 = scmp.eq.s32.totalorder %s490_s15, 0  ;;  %p35_p6 = scmp.eq.s32.totalorder %s32_s19, 0 }
   0xa   : > { %p514_p8 = scmp.lt.s32.totalorder %s644_s14, 2  ;;  %s126_s22 = sand.u32 1, %s632_s11  }
   0xb   : > { %p708_p7 = por %p51_p5, %p50_p4  ;;  %s505_s23 = sshll.u32 %s640_s13, 11 }
   0xc   : > { %s714_s21 = scalar_select %p35_p6, %s632_s11, %s37_s17  }
   0xd   : > { %s494_s24 = sshll.u32 %s126_s22, 7  ;;  %s138_s27 = scalar_lea.hbm %s857_s0, %s505_s23 }
   0xe   : > { %s130_s28 = scalar_lea.vmem [#allocation4], %s494_s24  ;;  %p723_p9 = pnand %p514_p8, %p701_p3 }
   0xf   : > { %s139_s29 = sshll.u32 %s130_s28, 4  ;;  %s127_s3 = scalar_lea.sflag [#allocation5], %s126_s22  ;;  %s140_s29 = int_to_ptr.vmem [resolvable:$true] %s139_s29 }
  0x10   : > { %p568_p10 = pneg %p723_p9  ;;  %s579_s4 = scalar_lea.vmem %s140_s29, 2048 }
  0x11   : > { %p580_p11 = scmp.ne.s32.totalorder %s140_s29, %s579_s4  ;;  %s646_s5 = smov [#allocation4]  }
  0x12   : > { %s584_s6 = sshll.u32 %s646_s5, 4  ;;  %s585_s6 = int_to_ptr.vmem [resolvable:$false] %s584_s6 }
  0x13   : > { %p582_p12 = pnand %p580_p11, %p568_p10  ;;  %s586_s7 = scalar_lea.vmem %s585_s6, 4096 }
  0x14   : > { %p587_p0 = scmp.lt.s32.totalorder %s140_s29, %s585_s6  ;;  %p588_p1 = scmp.lt.s32.totalorder %s586_s7, %s579_s4 }
  0x15   : > { %p583_p13 = pneg %p582_p12 }
  0x16   : > { %p589_p2 = por %p588_p1, %p587_p0 }
  0x18   : > { %p590_p3 = pnand %p589_p2, %p583_p13 }
  0x1a   : > { %593 = shalt.err (!%p590_p3)
}
  0x1b   : > { %s647_s8 = smov 256   ;;  %s648_s9 = smov 16  }
  0x1c   : > { %513 = dma.hbm_to_vmem [thread:$0]  (!%p723_p9), %s138_s27, 2048, %s140_s29, %s127_s3, %s647_s8, %s647_s8, %s648_s9  }
  0x1d   : > { %p497_p4 = scmp.ge.s32.totalorder %s644_s14, 1  ;;  %p147_p5 = scmp.lt.s32.totalorder %s644_s14, 3 }
  0x1f   : > { %p148_p6 = pnand %p497_p4, %p147_p5 }
  0x20   : > { %s153_s15 = sand.u32 (!%p148_p6), 1, %s628_s10  }
  0x21   : > { %151 = sbr.rel (%p148_p6) target bundleno = 220 (0xdc), region = 24  ;;  %s498_s17 = sshll.u32 (!%p148_p6), %s153_s15, 7 }
  0x22   : > { %s154_s18 = scalar_lea.sflag (!%p148_p6), [#allocation5], %s153_s15  ;;  %s734_s19 = scalar_lea.vmem (!%p148_p6), [#allocation4], %s498_s17 }
  0x26   : > { %619 = dma.done.wait (%p708_p7), %s154_s18, 2048  }
  0x27   : > { %621 = vsyncadd (%p708_p7), %s154_s18, 4294965248  ;;  %vm198_vm0 = vcmask 7168   ;;  %v649_v0 = vmov 0.0   ;;  %v219_v1 = vld [vmem:[%s734_s19 + $0x20] sm:$0xff]  ;;  %v220_v2 = vld [vmem:[%s734_s19 + $0x28] sm:$0xff]  ;;  %p184_p7 = scmp.lt.s32.totalorder %s636_s12, 1 }
  0x28   : > { %201 = vst.msk [vmem:[#allocation2 + $0x10] sm:$0xff] %vm198_vm0, %v649_v0  ;;  %199 = vst.msk [vmem:[#allocation2] sm:$0xff] %vm198_vm0, %v649_v0  ;;  %v215_v3 = vld [vmem:[%s734_s19] sm:$0xff]  ;;  %v245_v4 = vadd.f32 %v220_v2, %v219_v1  ;;  %v216_v5 = vld [vmem:[%s734_s19 + $0x8] sm:$0xff]  ;;  %v292_v32 = vmul.f32 %v219_v1, %v219_v1  ;;  %v293_v33 = vmul.f32 %v220_v2, %v220_v2 }
  0x29   : > { %200 = vst.msk [vmem:[#allocation2 + $0x8] sm:$0xff] %vm198_vm0, %v649_v0  ;;  %202 = vst.msk [vmem:[#allocation2 + $0x18] sm:$0xff] %vm198_vm0, %v649_v0  ;;  %v221_v6 = vld [vmem:[%s734_s19 + $0x30] sm:$0xff]  ;;  %v222_v7 = vld [vmem:[%s734_s19 + $0x38] sm:$0xff]  ;;  %v239_v8 = vadd.f32 %v216_v5, %v215_v3  ;;  %v288_v26 = vmul.f32 %v215_v3, %v215_v3  ;;  %v289_v27 = vmul.f32 %v216_v5, %v216_v5  ;;  %s871_s12 = smov (!%p184_p7, %s636_s12), 1 }
  0x2a   : > { %203 = vst.msk [vmem:[#allocation2 + $0x20] sm:$0xff] %vm198_vm0, %v649_v0  ;;  %204 = vst.msk [vmem:[#allocation2 + $0x28] sm:$0xff] %vm198_vm0, %v649_v0  ;;  %v217_v9 = vld [vmem:[%s734_s19 + $0x10] sm:$0xff]  ;;  %v218_v10 = vld [vmem:[%s734_s19 + $0x18] sm:$0xff]  ;;  %246 = vadd.xlane.f32.xlu1 %v245_v4  ;;  %v248_v11 = vadd.f32 %v222_v7, %v221_v6  ;;  %v294_v30 = vmul.f32 %v221_v6, %v221_v6  ;;  %v295_v31 = vmul.f32 %v222_v7, %v222_v7  ;;  %s506_s20 = sshll.u32 %s871_s12, 6 }
  0x2b   : > { %205 = vst.msk [vmem:[#allocation2 + $0x30] sm:$0xff] %vm198_vm0, %v649_v0  ;;  %206 = vst.msk [vmem:[#allocation2 + $0x38] sm:$0xff] %vm198_vm0, %v649_v0  ;;  %240 = vadd.xlane.f32.xlu0 %v239_v8  ;;  %v242_v12 = vadd.f32 %v218_v10, %v217_v9  ;;  %v225_v13 = vld [vmem:[%s734_s19 + $0x50] sm:$0xff]  ;;  %v226_v14 = vld [vmem:[%s734_s19 + $0x58] sm:$0xff]  ;;  %v290_v24 = vmul.f32 %v217_v9, %v217_v9  ;;  %v291_v25 = vmul.f32 %v218_v10, %v218_v10  ;;  %s785_s24 = scalar_lea.vmem %s858_s1, %s506_s20  ;;  %s816_s27 = scalar_lea.vmem %s859_s2, %s506_s20 }
  0x2c   : > { %207 = vst.msk [vmem:[#allocation3] sm:$0xff] %vm198_vm0, %v649_v0  ;;  %208 = vst.msk [vmem:[#allocation3 + $0x8] sm:$0xff] %vm198_vm0, %v649_v0  ;;  %v223_v15 = vld [vmem:[%s734_s19 + $0x40] sm:$0xff]  ;;  %v224_v16 = vld [vmem:[%s734_s19 + $0x48] sm:$0xff]  ;;  %v254_v17 = vadd.f32 %v226_v14, %v225_v13  ;;  %v304_v34 = vadd.f32 %v289_v27, %v288_v26  ;;  %v313_v35 = vadd.f32 %v295_v31, %v294_v30 }
  0x2d   : > { %209 = vst.msk [vmem:[#allocation3 + $0x10] sm:$0xff] %vm198_vm0, %v649_v0  ;;  %210 = vst.msk [vmem:[#allocation3 + $0x18] sm:$0xff] %vm198_vm0, %v649_v0  ;;  %v251_v18 = vadd.f32 %v224_v16, %v223_v15  ;;  %v229_v19 = vld [vmem:[%s734_s19 + $0x70] sm:$0xff]  ;;  %v230_v20 = vld [vmem:[%s734_s19 + $0x78] sm:$0xff]  ;;  %v307_v29 = vadd.f32 %v291_v25, %v290_v24  ;;  %v298_v36 = vmul.f32 %v225_v13, %v225_v13 }
  0x2e   : > { %211 = vst.msk [vmem:[#allocation3 + $0x20] sm:$0xff] %vm198_vm0, %v649_v0  ;;  %212 = vst.msk [vmem:[#allocation3 + $0x28] sm:$0xff] %vm198_vm0, %v649_v0  ;;  %249 = vadd.xlane.f32.xlu1 %v248_v11  ;;  %v227_v21 = vld [vmem:[%s734_s19 + $0x60] sm:$0xff]  ;;  %v228_v22 = vld [vmem:[%s734_s19 + $0x68] sm:$0xff]  ;;  %v260_v23 = vadd.f32 %v230_v20, %v229_v19  ;;  %v299_v37 = vmul.f32 %v226_v14, %v226_v14  ;;  %v310_v38 = vadd.f32 %v293_v33, %v292_v32 }
  0x2f   : > { %213 = vst.msk [vmem:[#allocation3 + $0x30] sm:$0xff] %vm198_vm0, %v649_v0  ;;  %214 = vst.msk [vmem:[#allocation3 + $0x38] sm:$0xff] %vm198_vm0, %v649_v0  ;;  %243 = vadd.xlane.f32.xlu0 %v242_v12  ;;  %v257_v28 = vadd.f32 %v228_v22, %v227_v21  ;;  %v296_v39 = vmul.f32 %v223_v15, %v223_v15  ;;  %v297_v40 = vmul.f32 %v224_v16, %v224_v16  ;;  %v233_v49 = vld [vmem:[#allocation2 + $0x10] sm:$0xff]  ;;  %v231_v50 = vld [vmem:[#allocation2] sm:$0xff] }
  0x30   : > { %v319_v41 = vadd.f32 %v299_v37, %v298_v36  ;;  %v302_v42 = vmul.f32 %v229_v19, %v229_v19  ;;  %v303_v43 = vmul.f32 %v230_v20, %v230_v20  ;;  %v300_v45 = vmul.f32 %v227_v21, %v227_v21  ;;  %v234_v55 = vld [vmem:[#allocation2 + $0x18] sm:$0xff]  ;;  %v232_v56 = vld [vmem:[#allocation2 + $0x8] sm:$0xff] }
  0x31   : > { %v316_v44 = vadd.f32 %v297_v40, %v296_v39  ;;  %v301_v46 = vmul.f32 %v228_v22, %v228_v22  ;;  %v236_v61 = vld [vmem:[#allocation2 + $0x28] sm:$0xff]  ;;  %v235_v62 = vld [vmem:[#allocation2 + $0x20] sm:$0xff] }
  0x32   : > { %255 = vadd.xlane.f32.xlu1 %v254_v17  ;;  %v325_v47 = vadd.f32 %v303_v43, %v302_v42  ;;  %v238_v4 = vld [vmem:[#allocation2 + $0x38] sm:$0xff]  ;;  %v237_v6 = vld [vmem:[#allocation2 + $0x30] sm:$0xff] }
  0x33   : > { %252 = vadd.xlane.f32.xlu0 %v251_v18  ;;  %v322_v48 = vadd.f32 %v301_v46, %v300_v45  ;;  %v281_v12 = vld [vmem:[#allocation3 + $0x8] sm:$0xff]  ;;  %v280_v14 = vld [vmem:[#allocation3] sm:$0xff] }
  0x34   : > { %v283_v20 = vld [vmem:[#allocation3 + $0x18] sm:$0xff]  ;;  %v282_v22 = vld [vmem:[#allocation3 + $0x10] sm:$0xff] }
  0x35   : > { %v284_v30 = vld [vmem:[#allocation3 + $0x20] sm:$0xff] }
  0x36   : > { %261 = vadd.xlane.f32.xlu1 %v260_v23  ;;  %v287_v36 = vld [vmem:[#allocation3 + $0x38] sm:$0xff] }
  0x37   : > { %258 = vadd.xlane.f32.xlu0 %v257_v28  ;;  %v285_v28 = vld [vmem:[#allocation3 + $0x28] sm:$0xff] }
  0x3a   : > { %308 = vadd.xlane.f32.xlu1 %v307_v29 }
  0x3b   : > { %305 = vadd.xlane.f32.xlu0 %v304_v34 }
  0x3e   : > { %314 = vadd.xlane.f32.xlu1 %v313_v35 }
  0x3f   : > { %311 = vadd.xlane.f32.xlu0 %v310_v38  ;;  %v286_v38 = vld [vmem:[#allocation3 + $0x30] sm:$0xff] }
  0x42   : > { %320 = vadd.xlane.f32.xlu1 %v319_v41 }
  0x43   : > { %317 = vadd.xlane.f32.xlu0 %v316_v44 }
  0x46   : > { %326 = vadd.xlane.f32.xlu1 %v325_v47 }
  0x47   : > { %323 = vadd.xlane.f32.xlu0 %v322_v48 }
  0xb3   : > { %v247_v51 = vpop.xlane.xlu1 %246 }
  0xb4   : > { %v265_v52 = vadd.f32 %v247_v51, %v233_v49  ;;  %v241_v53 = vpop.xlane.xlu0 %240 }
  0xb5   : > { %v263_v54 = vadd.f32 %v241_v53, %v231_v50 }
  0xb6   : > { %274 = vst.msk [vmem:[#allocation2 + $0x10] sm:$0xff] %vm198_vm0, %v265_v52 }
  0xb7   : > { %272 = vst.msk [vmem:[#allocation2] sm:$0xff] %vm198_vm0, %v263_v54  ;;  %v250_v57 = vpop.xlane.xlu1 %249 }
  0xb8   : > { %v266_v58 = vadd.f32 %v250_v57, %v234_v55  ;;  %v244_v59 = vpop.xlane.xlu0 %243 }
  0xb9   : > { %v264_v60 = vadd.f32 %v244_v59, %v232_v56 }
  0xba   : > { %275 = vst.msk [vmem:[#allocation2 + $0x18] sm:$0xff] %vm198_vm0, %v266_v58 }
  0xbb   : > { %273 = vst.msk [vmem:[#allocation2 + $0x8] sm:$0xff] %vm198_vm0, %v264_v60  ;;  %v256_v63 = vpop.xlane.xlu1 %255 }
  0xbc   : > { %v268_v0 = vadd.f32 %v256_v63, %v236_v61  ;;  %v253_v1 = vpop.xlane.xlu0 %252 }
  0xbd   : > { %v349_v2 = vld [vmem:[#allocation2 + $0x10] sm:$0xff]  ;;  %v267_v3 = vadd.f32 %v253_v1, %v235_v62 }
  0xbe   : > { %357 = vst.msk [vmem:[%s785_s24 + $0x10] sm:$0xff] %vm198_vm0, %v349_v2  ;;  %v347_v5 = vld [vmem:[#allocation2] sm:$0xff]  ;;  %277 = vst.msk [vmem:[#allocation2 + $0x28] sm:$0xff] %vm198_vm0, %v268_v0 }
  0xbf   : > { %355 = vst.msk [vmem:[%s785_s24] sm:$0xff] %vm198_vm0, %v347_v5  ;;  %276 = vst.msk [vmem:[#allocation2 + $0x20] sm:$0xff] %vm198_vm0, %v267_v3  ;;  %v262_v7 = vpop.xlane.xlu1 %261 }
  0xc0   : > { %v270_v8 = vadd.f32 %v262_v7, %v238_v4  ;;  %v259_v9 = vpop.xlane.xlu0 %258 }
  0xc1   : > { %v350_v10 = vld [vmem:[#allocation2 + $0x18] sm:$0xff]  ;;  %v269_v11 = vadd.f32 %v259_v9, %v237_v6 }
  0xc2   : > { %358 = vst.msk [vmem:[%s785_s24 + $0x18] sm:$0xff] %vm198_vm0, %v350_v10  ;;  %v348_v13 = vld [vmem:[#allocation2 + $0x8] sm:$0xff]  ;;  %279 = vst.msk [vmem:[#allocation2 + $0x38] sm:$0xff] %vm198_vm0, %v270_v8 }
  0xc3   : > { %356 = vst.msk [vmem:[%s785_s24 + $0x8] sm:$0xff] %vm198_vm0, %v348_v13  ;;  %278 = vst.msk [vmem:[#allocation2 + $0x30] sm:$0xff] %vm198_vm0, %v269_v11  ;;  %v309_v15 = vpop.xlane.xlu1 %308 }
  0xc4   : > { %v329_v16 = vadd.f32 %v309_v15, %v281_v12  ;;  %v306_v17 = vpop.xlane.xlu0 %305 }
  0xc5   : > { %v352_v18 = vld [vmem:[#allocation2 + $0x28] sm:$0xff]  ;;  %v328_v19 = vadd.f32 %v306_v17, %v280_v14 }
  0xc6   : > { %360 = vst.msk [vmem:[%s785_s24 + $0x28] sm:$0xff] %vm198_vm0, %v352_v18  ;;  %v351_v21 = vld [vmem:[#allocation2 + $0x20] sm:$0xff]  ;;  %337 = vst.msk [vmem:[#allocation3 + $0x8] sm:$0xff] %vm198_vm0, %v329_v16 }
  0xc7   : > { %359 = vst.msk [vmem:[%s785_s24 + $0x20] sm:$0xff] %vm198_vm0, %v351_v21  ;;  %336 = vst.msk [vmem:[#allocation3] sm:$0xff] %vm198_vm0, %v328_v19  ;;  %v315_v23 = vpop.xlane.xlu1 %314 }
  0xc8   : > { %v331_v24 = vadd.f32 %v315_v23, %v283_v20  ;;  %v312_v25 = vpop.xlane.xlu0 %311 }
  0xc9   : > { %v354_v26 = vld [vmem:[#allocation2 + $0x38] sm:$0xff]  ;;  %v330_v27 = vadd.f32 %v312_v25, %v282_v22 }
  0xca   : > { %362 = vst.msk [vmem:[%s785_s24 + $0x38] sm:$0xff] %vm198_vm0, %v354_v26  ;;  %v353_v29 = vld [vmem:[#allocation2 + $0x30] sm:$0xff]  ;;  %339 = vst.msk [vmem:[#allocation3 + $0x18] sm:$0xff] %vm198_vm0, %v331_v24 }
  0xcb   : > { %361 = vst.msk [vmem:[%s785_s24 + $0x30] sm:$0xff] %vm198_vm0, %v353_v29  ;;  %338 = vst.msk [vmem:[#allocation3 + $0x10] sm:$0xff] %vm198_vm0, %v330_v27  ;;  %v321_v31 = vpop.xlane.xlu1 %320 }
  0xcc   : > { %v333_v32 = vadd.f32 %v321_v31, %v285_v28  ;;  %v318_v33 = vpop.xlane.xlu0 %317 }
  0xcd   : > { %v364_v34 = vld [vmem:[#allocation3 + $0x8] sm:$0xff]  ;;  %v332_v35 = vadd.f32 %v318_v33, %v284_v30 }
  0xce   : > { %372 = vst.msk [vmem:[%s816_s27 + $0x8] sm:$0xff] %vm198_vm0, %v364_v34  ;;  %v363_v37 = vld [vmem:[#allocation3] sm:$0xff]  ;;  %341 = vst.msk [vmem:[#allocation3 + $0x28] sm:$0xff] %vm198_vm0, %v333_v32 }
  0xcf   : > { %371 = vst.msk [vmem:[%s816_s27] sm:$0xff] %vm198_vm0, %v363_v37  ;;  %340 = vst.msk [vmem:[#allocation3 + $0x20] sm:$0xff] %vm198_vm0, %v332_v35  ;;  %v327_v39 = vpop.xlane.xlu1 %326 }
  0xd0   : > { %v335_v40 = vadd.f32 %v327_v39, %v287_v36  ;;  %v324_v41 = vpop.xlane.xlu0 %323 }
  0xd1   : > { %v366_v42 = vld [vmem:[#allocation3 + $0x18] sm:$0xff]  ;;  %v334_v43 = vadd.f32 %v324_v41, %v286_v38 }
  0xd2   : > { %374 = vst.msk [vmem:[%s816_s27 + $0x18] sm:$0xff] %vm198_vm0, %v366_v42  ;;  %v365_v44 = vld [vmem:[#allocation3 + $0x10] sm:$0xff]  ;;  %343 = vst.msk [vmem:[#allocation3 + $0x38] sm:$0xff] %vm198_vm0, %v335_v40 }
  0xd3   : > { %373 = vst.msk [vmem:[%s816_s27 + $0x10] sm:$0xff] %vm198_vm0, %v365_v44  ;;  %342 = vst.msk [vmem:[#allocation3 + $0x30] sm:$0xff] %vm198_vm0, %v334_v43 }
  0xd5   : > { %v368_v45 = vld [vmem:[#allocation3 + $0x28] sm:$0xff] }
  0xd6   : > { %376 = vst.msk [vmem:[%s816_s27 + $0x28] sm:$0xff] %vm198_vm0, %v368_v45  ;;  %v367_v46 = vld [vmem:[#allocation3 + $0x20] sm:$0xff] }
  0xd7   : > { %375 = vst.msk [vmem:[%s816_s27 + $0x20] sm:$0xff] %vm198_vm0, %v367_v46 }
  0xd9   : > { %v370_v47 = vld [vmem:[#allocation3 + $0x38] sm:$0xff] }
  0xda   : > { %378 = vst.msk [vmem:[%s816_s27 + $0x38] sm:$0xff] %vm198_vm0, %v370_v47  ;;  %v369_v48 = vld [vmem:[#allocation3 + $0x30] sm:$0xff] }
  0xdb   : > { %377 = vst.msk [vmem:[%s816_s27 + $0x30] sm:$0xff] %vm198_vm0, %v369_v48 }
  0xdc PF: > { %s16_s14 = sadd.s32 1, %s644_s14   ;;  %s863_s9 = smov %s628_s10 }
  0xdd   : > { %p13_p8 = scmp.ge.s32.totalorder %s16_s14, 4   ;;  %s864_s10 = smov %s632_s11 }
  0xde   : > { %s865_s11 = smov %s714_s21  ;;  %s866_s12 = smov %s640_s13 }
  0xdf   : > { %s867_s13 = smov %s869_s16  ;;  %15 = sbr.rel (!%p13_p8) target bundleno = 4 (0x4), region = 84 }
  0xe4   :  { %416 = vsyncpa [#allocation5], 1 }
  0xe5   :  { %418 = vsyncpa [#allocation5 + $0x1], 1 }

</bundles_post_ra>
